<compile_context>
chip_gen: v5e
topology: v5e:2x2
jax: 0.10.0
libtpu: 0.0.40
codegen_flags: <defaults>
</compile_context>

<pallas_src>
import functools

import jax
import jax.numpy as jnp
from jax.experimental import pallas as pl
from jax.experimental.pallas import tpu as pltpu


def _round_up(x, m):
    return ((x + m - 1) // m) * m


def _cdiv(a, b):
    return -(-a // b)


def _pad2d(x, rows, cols, dtype):
    """Cast + zero-pad a 2-D array; no copy pass when already conforming."""
    r, c = x.shape
    x = x.astype(dtype)
    if r == rows and c == cols:
        return x
    return jnp.zeros((rows, cols), dtype).at[:r, :c].set(x)


def _project_kernel(x_ref, w_ref, hi_ref, lo_ref):
    """hn_proj tile = h_neigh tile @ Wn^T, emitted as a bf16 hi/lo split.

    hi + lo reconstructs the f32 projection to ~1e-5 relative error, so the
    downstream adjacency matmul can use the fast bf16 MXU path without the
    accuracy loss of a single bf16 cast.
    """
    p = jnp.dot(x_ref[...], w_ref[...], preferred_element_type=jnp.float32)
    hi = p.astype(jnp.bfloat16)
    hi_ref[...] = hi
    lo_ref[...] = (p - hi.astype(jnp.float32)).astype(jnp.bfloat16)


def _aggregate_kernel(adj_ref, hn_hi_ref, hn_lo_ref, hs_ref, ws_ref, o_ref,
                      acc_ref, deg_ref, *, mean: bool, norm: bool,
                      hn_resident: bool, tk: int):
    """acc += adj_tile @ (hn_hi + hn_lo); deg += row-sum(adj); epilogue on last k.

    adj_ref     : [TM, TK]                bf16 (0/1 adjacency tile, dst x src)
    hn_hi/lo    : [N_src_p|TK, F_out_p]   bf16 (split pre-projected source features)
    hs_ref      : [TM, F_self_p]          f32  (destination-node features)
    ws_ref      : [F_self_p, F_out_p]     f32  (fc_self.weight^T, zero-padded)
    o_ref       : [TM, F_out_p]           f32  output
    acc_ref     : [TM, F_out_p]           f32  VMEM accumulator scratch
    deg_ref     : [TM, 1]                 f32  in-degree accumulator scratch
    """
    k = pl.program_id(1)

    @pl.when(k == 0)
    def _():
        acc_ref[...] = jnp.zeros_like(acc_ref)
        deg_ref[...] = jnp.zeros_like(deg_ref)

    adj = adj_ref[...]
    if hn_resident:
        start = pl.multiple_of(k * tk, 128)
        hi = hn_hi_ref[pl.ds(start, tk), :]
        lo = hn_lo_ref[pl.ds(start, tk), :]
    else:
        hi = hn_hi_ref[...]
        lo = hn_lo_ref[...]

    acc_ref[...] += (jnp.dot(adj, hi, preferred_element_type=jnp.float32)
                     + jnp.dot(adj, lo, preferred_element_type=jnp.float32))
    if mean:
        # Row-sum rides the XLU slot, effectively free next to the MXU matmuls.
        deg_ref[...] += jnp.sum(adj.astype(jnp.float32), axis=1, keepdims=True)

    @pl.when(k == pl.num_programs(1) - 1)
    def _():
        z = acc_ref[...]
        if mean:
            deg = deg_ref[...]
            z = z * jnp.where(deg == 0.0, 1.0, 1.0 / deg)   # DGL-style zero-deg guard
        z = z + jnp.dot(hs_ref[...], ws_ref[...],
                        preferred_element_type=jnp.float32)  # + fc_self(h_self)
        z = jnp.maximum(z, 0.0)                              # relu
        if norm:
            # padded output columns are exactly zero -> don't affect the row norm
            sumsq = jnp.sum(z * z, axis=-1, keepdims=True)
            z = z * jnp.where(sumsq == 0.0, 1.0, 1.0 / jnp.sqrt(sumsq))
        o_ref[...] = z.astype(o_ref.dtype)


def conv_layer_forward(adj, h_neigh, h_self, w_neigh, w_self, *,
                       aggregation="mean", norm=True, tm=512, tk=2048,
                       resident_hn=None):
    """ConvLayer.forward (eval mode) with dense adjacency adj[dst, src] in {0,1}.

    adj may already be bf16 (0/1 is exact); w_neigh/w_self are nn.Linear weights
    with layout [F_out, F_in].
    """
    if aggregation not in ("mean", "sum"):
        raise KeyError(f"Aggregation function {aggregation} not supported...")

    n_dst, n_src = adj.shape
    f_neigh = h_neigh.shape[1]
    f_self = h_self.shape[1]
    f_out = w_neigh.shape[0]
    f32 = jnp.float32
    bf16 = jnp.bfloat16

    # ---- tile sizes -----------------------------------------------------------------
    tm = max(16, min(_round_up(tm, 16), _round_up(n_dst, 16)))
    if _cdiv(n_dst, tm) < 2 and n_dst > 16:
        # Keep >= 2 dst tiles so the "parallel" axis shards across v7x's 2 TensorCores.
        tm = max(16, _round_up(_cdiv(n_dst, 2), 16))
    tk = max(128, min(_round_up(tk, 128), _round_up(n_src, 128)))

    f_out_p = _round_up(f_out, 128)      # lane-dense output / MXU N dim
    f_neigh_p = _round_up(f_neigh, 128)  # lane-dense MXU K dim (kernel 1)
    f_self_p = _round_up(f_self, 128)    # lane-dense MXU K dim (epilogue)
    n_dst_p = _round_up(n_dst, tm)
    n_src_p = _round_up(n_src, tk)

    # ---- padded operands (pads are exact zeros; adj pad is a no-op when aligned) -----
    adj_p = _pad2d(adj, n_dst_p, n_src_p, bf16)
    hn_p = _pad2d(h_neigh, n_src_p, f_neigh_p, f32)
    hs_p = _pad2d(h_self, n_dst_p, f_self_p, f32)
    wn_t = _pad2d(jnp.transpose(w_neigh), f_neigh_p, f_out_p, f32)
    ws_t = _pad2d(jnp.transpose(w_self), f_self_p, f_out_p, f32)

    # ---- Kernel 1: pre-project sources to F_out (bf16 hi/lo split output) ------------
    hn_hi, hn_lo = pl.pallas_call(
        _project_kernel,
        out_shape=(jax.ShapeDtypeStruct((n_src_p, f_out_p), bf16),
                   jax.ShapeDtypeStruct((n_src_p, f_out_p), bf16)),
        grid=(n_src_p // tk,),
        in_specs=[pl.BlockSpec((tk, f_neigh_p), lambda i: (i, 0)),
                  pl.BlockSpec((f_neigh_p, f_out_p), lambda i: (0, 0))],
        out_specs=(pl.BlockSpec((tk, f_out_p), lambda i: (i, 0)),
                   pl.BlockSpec((tk, f_out_p), lambda i: (i, 0))),
        compiler_params=pltpu.CompilerParams(dimension_semantics=("parallel",)),
    )(hn_p, wn_t)

    # ---- Kernel 2: tiled adjacency matmul + epilogue ---------------------------------
    hn_slab_bytes = 2 * n_src_p * f_out_p * 2          # hi + lo, bf16
    if resident_hn is None:
        resident_hn = hn_slab_bytes <= (8 << 20)       # resident budget (v7x-safe)

    if resident_hn:
        hn_spec = pl.BlockSpec((n_src_p, f_out_p), lambda i, k: (0, 0))
    else:
        hn_spec = pl.BlockSpec((tk, f_out_p), lambda i, k: (k, 0))

    grid = (n_dst_p // tm, n_src_p // tk)

    hn_rows = n_src_p if resident_hn else tk
    vmem_need = (2 * tm * tk * 2                        # adj (bf16, double-buffered)
                 + 2 * 2 * hn_rows * f_out_p * 2        # hn hi+lo
                 + 2 * tm * f_self_p * 4                # h_self
                 + 2 * f_self_p * f_out_p * 4           # Ws^T
                 + 2 * tm * f_out_p * 4                 # output
                 + tm * f_out_p * 4 + tm * 128 * 4)     # acc + deg scratch
    vmem_limit = max(32 << 20, min(vmem_need + (4 << 20), 48 << 20))

    hn_reads = 1 if resident_hn else grid[0]
    flops = 2 * 2 * n_dst_p * n_src_p * f_out_p + 2 * n_dst_p * f_self_p * f_out_p
    bytes_accessed = (n_dst_p * n_src_p * 2
                      + hn_reads * 2 * n_src_p * f_out_p * 2
                      + n_dst_p * f_self_p * 4 + f_self_p * f_out_p * 4
                      + n_dst_p * f_out_p * 4)

    out_p = pl.pallas_call(
        functools.partial(_aggregate_kernel, mean=(aggregation == "mean"),
                          norm=norm, hn_resident=resident_hn, tk=tk),
        out_shape=jax.ShapeDtypeStruct((n_dst_p, f_out_p), f32),
        grid=grid,
        in_specs=[pl.BlockSpec((tm, tk), lambda i, k: (i, k)),
                  hn_spec,
                  hn_spec,
                  pl.BlockSpec((tm, f_self_p), lambda i, k: (i, 0)),
                  pl.BlockSpec((f_self_p, f_out_p), lambda i, k: (0, 0))],
        out_specs=pl.BlockSpec((tm, f_out_p), lambda i, k: (i, 0)),
        scratch_shapes=[pltpu.VMEM((tm, f_out_p), f32),
                        pltpu.VMEM((tm, 1), f32)],
        compiler_params=pltpu.CompilerParams(
            dimension_semantics=("parallel", "arbitrary"),
            vmem_limit_bytes=vmem_limit),
        cost_estimate=pl.CostEstimate(
            flops=flops,
            transcendentals=n_dst_p if norm else 0,
            bytes_accessed=bytes_accessed),
    )(adj_p, hn_hi, hn_lo, hs_p, ws_t)

    return out_p[:n_dst, :f_out]


def xavier_uniform(key, shape, gain):
    """Matches nn.init.xavier_uniform_ for a 2-D [fan_out, fan_in] Linear weight."""
    fan_out, fan_in = shape
    bound = gain * jnp.sqrt(6.0 / (fan_in + fan_out))
    return jax.random.uniform(key, shape, jnp.float32, minval=-bound, maxval=bound)


def reference_forward(adj, h_neigh, h_self, w_neigh, w_self,
                      *, aggregation="mean", norm=True):
    agg = adj @ h_neigh
    if aggregation == "mean":
        deg = jnp.sum(adj, axis=-1, keepdims=True)
        agg = agg / jnp.where(deg == 0.0, 1.0, deg)
    z = jax.nn.relu(h_self @ w_self.T + agg @ w_neigh.T)
    if norm:
        zn = jnp.linalg.norm(z, axis=1, keepdims=True)
        z = z / jnp.where(zn == 0.0, 1.0, zn)
    return z


if __name__ == "__main__":
    # Small deterministic example: bipartite block (src -> dst), like DGL blocks.
    # Adjacency is built directly in bf16 (0/1 exact) so the wrapper does no cast/pad
    # pass.  Tiles below are intentionally small ONLY so this tiny problem exercises a
    # real multi-tile grid (2 dst x 2 src tiles); production defaults are tm=512/tk=2048.
    N_SRC, N_DST = 512, 256
    IN_NEIGH, IN_SELF, OUT = 64, 48, 96

    key = jax.random.PRNGKey(0)
    k_adj, k_hn, k_hs, k_wn, k_ws = jax.random.split(key, 5)

    adj_mask = jax.random.bernoulli(k_adj, p=0.05, shape=(N_DST, N_SRC))
    adj_mask = adj_mask.at[0, :].set(False)          # exercise the zero-in-degree guard
    adj_bf16 = adj_mask.astype(jnp.bfloat16)         # kernel input (no wrapper cast)
    adj_f32 = adj_mask.astype(jnp.float32)           # reference only

    h_neigh = jax.random.normal(k_hn, (N_SRC, IN_NEIGH), jnp.float32)
    h_self = jax.random.normal(k_hs, (N_DST, IN_SELF), jnp.float32)

    gain = jnp.sqrt(2.0)  # nn.init.calculate_gain('relu')
    w_neigh = xavier_uniform(k_wn, (OUT, IN_NEIGH), gain)  # fc_neigh.weight
    w_self = xavier_uniform(k_ws, (OUT, IN_SELF), gain)    # fc_self.weight

    configs = [
        # (aggregation, norm, tk, resident_hn)  -- covers resident + streamed hn paths
        ("mean", True, 256, None),
        ("sum", False, 256, False),
    ]
    for agg_fn, use_norm, tk, res in configs:
        z = conv_layer_forward(adj_bf16, h_neigh, h_self, w_neigh, w_self,
                               aggregation=agg_fn, norm=use_norm, tk=tk,
                               resident_hn=res)
        z = jax.block_until_ready(z)

        z_ref = reference_forward(adj_f32, h_neigh, h_self, w_neigh, w_self,
                                  aggregation=agg_fn, norm=use_norm)
        assert z.shape == (N_DST, OUT)
        max_err = float(jnp.max(jnp.abs(z - z_ref)))
        # hi/lo bf16 split keeps the aggregation at ~1e-5 relative error, so a tight
        # tolerance holds even for the un-normalized "sum" configuration.
        assert jnp.allclose(z, z_ref, atol=2e-3, rtol=2e-3), \
            f"mismatch vs reference ({agg_fn}, norm={use_norm}): max err {max_err}"

    print("KERNEL_OK")
</pallas_src>

<mosaic_0001>
module attributes {stable_mosaic.version = 11 : i64} {
  func.func @_project_kernel(%arg0: i32, %arg1: memref<256x128xf32, #tpu.memory_space<vmem>>, %arg2: memref<128x128xf32, #tpu.memory_space<vmem>>, %arg3: memref<256x128xbf16, #tpu.memory_space<vmem>>, %arg4: memref<256x128xbf16, #tpu.memory_space<vmem>>) attributes {dimension_semantics = [#tpu.dimension_semantics<parallel>], iteration_bounds = array<i64: 2>, scalar_prefetch = 0 : i64, scratch_operands = 0 : i64, tpu.core_type = #tpu.core_type<tc>, window_params = [{transform_indices = @transform_0, window_bounds = array<i64: 256, 128>}, {pipeline_mode = #tpu.pipeline_mode<synchronous>, transform_indices = @transform_1, window_bounds = array<i64: 128, 128>}, {transform_indices = @transform_2, window_bounds = array<i64: 256, 128>}, {transform_indices = @transform_3, window_bounds = array<i64: 256, 128>}]} {
    %c0 = arith.constant 0 : index
    %c0_0 = arith.constant 0 : index
    %0 = vector.load %arg1[%c0, %c0_0] : memref<256x128xf32, #tpu.memory_space<vmem>>, vector<256x128xf32>
    %c0_1 = arith.constant 0 : index
    %c0_2 = arith.constant 0 : index
    %1 = vector.load %arg2[%c0_1, %c0_2] : memref<128x128xf32, #tpu.memory_space<vmem>>, vector<128x128xf32>
    %cst = arith.constant dense<0.000000e+00> : vector<256x128xf32>
    %2 = tpu.matmul %0, %1, %cst {dimension_numbers = #tpu.dot_dimension_numbers<[1], [0], [0], [1], [0, 0, 1, 1], [], []>} : vector<256x128xf32>, vector<128x128xf32>, vector<256x128xf32> -> vector<256x128xf32>
    %3 = arith.truncf %2 : vector<256x128xf32> to vector<256x128xbf16>
    %c0_3 = arith.constant 0 : index
    %c0_4 = arith.constant 0 : index
    %4 = vector.load %arg3[%c0_3, %c0_4] : memref<256x128xbf16, #tpu.memory_space<vmem>>, vector<256x128xbf16>
    tpu.vector_store %arg3[%c0_3, %c0_4], %3 {strides = array<i32>} : memref<256x128xbf16, #tpu.memory_space<vmem>>, vector<256x128xbf16>,
    %5 = arith.extf %3 : vector<256x128xbf16> to vector<256x128xf32>
    %6 = arith.subf %2, %5 : vector<256x128xf32>
    %7 = arith.truncf %6 : vector<256x128xf32> to vector<256x128xbf16>
    %c0_5 = arith.constant 0 : index
    %c0_6 = arith.constant 0 : index
    %8 = vector.load %arg4[%c0_5, %c0_6] : memref<256x128xbf16, #tpu.memory_space<vmem>>, vector<256x128xbf16>
    tpu.vector_store %arg4[%c0_5, %c0_6], %7 {strides = array<i32>} : memref<256x128xbf16, #tpu.memory_space<vmem>>, vector<256x128xbf16>,
    return
  }
  func.func @transform_0(%arg0: i32) -> (i32, i32) {
    %c0_i32 = arith.constant 0 : i32
    %c0_i32_0 = arith.constant 0 : i32
    return %arg0, %c0_i32 : i32, i32
  }
  func.func @transform_1(%arg0: i32) -> (i32, i32) {
    %c0_i32 = arith.constant 0 : i32
    %c0_i32_0 = arith.constant 0 : i32
    %c0_i32_1 = arith.constant 0 : i32
    return %c0_i32, %c0_i32_0 : i32, i32
  }
  func.func @transform_2(%arg0: i32) -> (i32, i32) {
    %c0_i32 = arith.constant 0 : i32
    %c0_i32_0 = arith.constant 0 : i32
    return %arg0, %c0_i32 : i32, i32
  }
  func.func @transform_3(%arg0: i32) -> (i32, i32) {
    %c0_i32 = arith.constant 0 : i32
    %c0_i32_0 = arith.constant 0 : i32
    return %arg0, %c0_i32 : i32, i32
  }
}

</mosaic_0001>

<bundles_post_ra>
// kernel: tpu_custom_call.1
= control target key start
LH: loop header
LB: loop body
LE: loop exit
PB: predicated region body
PF: predicated region fallthrough
CT: control target
= control target key end

     0   :  { %9 = vsyncpa [#allocation3], 0  ;;  %s1506_s0 = inlined_call_operand.hbm [shape: f32[512,128], index: 0, kind: input, shape index: {}]   ;;  %s1507_s1 = inlined_call_operand.hbm [shape: f32[128,128], index: 1, kind: input, shape index: {}]   ;;  %s1508_s2 = inlined_call_operand.hbm [shape: bf16[512,128], index: 2, kind: output, shape index: {0}]   ;;  %s1509_s3 = inlined_call_operand.hbm [shape: bf16[512,128], index: 3, kind: output, shape index: {1}]  }
   0x1   :  { %11 = vsyncpa [#allocation3 + $0x1], 0 }
   0x2   :  { %12 = vsyncpa [#allocation6], 0 }
   0x3   :  { %13 = vsyncpa [#allocation4], 0 }
   0x4   :  { %15 = vsyncpa [#allocation4 + $0x1], 0 }
   0x5   :  { %16 = vsyncpa [#allocation9], 0 }
   0x6   :  { %18 = vsyncpa [#allocation9 + $0x1], 0  ;;  %s1245_s12 = smov 0   ;;  %s1247_s13 = smov 0  }
   0x7   :  { %s1249_s14 = smov 0   ;;  %s1251_s15 = smov 0  }
   0x8 LB: > { %s1266_s16 = sadd.s32 4294967295, %s1218_s15   ;;  %s729_s17 = sadd.s32 4294967294, %s1218_s15   ;;  %s1218_s15 = sphi %s1251_s15, %s1519_s15   ;;  %s1214_s14 = sphi %s1249_s14, %s1518_s14   ;;  %s1210_s13 = sphi %s1247_s13, %s1517_s13   ;;  %s1206_s12 = sphi %s1245_s12, %s1516_s12  }
   0x9   : > { %p44_p0 = scmp.ne.s32.totalorder %s1210_s13, %s1206_s12  ;;  %p45_p1 = scmp.eq.s32.totalorder %s1266_s16, 0 }
   0xa   : > { %p89_p2 = scmp.eq.s32.totalorder %s1266_s16, 1  ;;  %p95_p3 = scmp.eq.s32.totalorder %s729_s17, 1 }
   0xb   : > { %p1275_p4 = por %p45_p1, %p44_p0  ;;  %p730_p5 = scmp.ge.s32.totalorder %s1218_s15, 1 }
   0xc   : > { %p1280_p6 = por %p95_p3, %p44_p0  ;;  %p128_p7 = scmp.lt.s32.totalorder %s1218_s15, 3 }
   0xd   : > { %s139_s22 = sshll.u32 %s1507_s1, 4  ;;  %s1220_s24 = smov [#allocation5]   ;;  %s140_s22 = int_to_ptr.hbm [resolvable:$true] %s139_s22 }
   0xe   : > { %p1288_p8 = pnand %p730_p5, %p128_p7  ;;  %s141_s25 = sshll.u32 %s1220_s24, 4  ;;  %s142_s25 = int_to_ptr.vmem [resolvable:$true] %s141_s25 }
   0xf   : > { %s1298_s26 = sadd.s32 1, %s1218_s15   ;;  %s1221_s27 = smov 128  }
  0x10   : > { %p1000_p9 = pneg %p1288_p8  ;;  %s1222_s28 = smov 8  }
  0x11   : > { %s28_s29 = ssub.s32 %s1218_s15, %s1298_s26  ;;  %s31_s30 = sadd.s32 1, %s1214_s14 }
  0x12   : > { %p1001_p10 = pnand %p1000_p9, %p45_p1  ;;  %p29_p12 = scmp.eq.s32.totalorder %s28_s29, 0 }
  0x13   : > { %p38_p13 = scmp.ne.s32.totalorder %s1214_s14, %s1210_s13  ;;  %p39_p0 = scmp.eq.s32.totalorder %s1218_s15, 0 }
  0x14   : > { %1003 = dma.hbm_to_vmem [thread:$0]  (!%p1001_p10), %s140_s22, 2048, %s142_s25, [#allocation6], %s1221_s27, %s1221_s27, %s1222_s28  }
  0x15   : > { %s1310_s4 = scalar_select %p29_p12, %s1214_s14, %s31_s30  }
  0x16   : > { %p1314_p3 = por %p89_p2, %p38_p13  ;;  %p1016_p5 = scmp.lt.s32.totalorder %s1218_s15, 2 }
  0x17   : > { %s155_s6 = sand.u32 1, %s1214_s14   ;;  %s749_s7 = sshll.u32 %s1218_s15, 8 }
  0x18   : > { %p40_p7 = por %p39_p0, %p38_p13  ;;  %s733_s8 = sshll.u32 %s155_s6, 8 }
  0x19   : > { %s164_s11 = scalar_lea.hbm %s1506_s0, %s749_s7  ;;  %s159_s20 = scalar_lea.vmem [#allocation2], %s733_s8 }
  0x1a   : > { %s165_s17 = sshll.u32 %s164_s11, 4  ;;  %s167_s21 = sshll.u32 %s159_s20, 4  ;;  %s166_s17 = int_to_ptr.hbm [resolvable:$true] %s165_s17  ;;  %s168_s21 = int_to_ptr.vmem [resolvable:$true] %s167_s21 }
  0x1b   : > { %p1324_p9 = pnand %p1016_p5, %p40_p7  ;;  %s156_s24 = scalar_lea.sflag [#allocation3], %s155_s6 }
  0x1c   : > { %s1086_s25 = sshra.s32 %s166_s17, 4  ;;  %s1093_s8 = scalar_lea.hbm %s1506_s0, 512  ;;  %s1087_s25 = int_to_ptr.hbm [resolvable:$true] %s1086_s25 }
  0x1d   : > { %s1088_s29 = scalar_lea.hbm %s1087_s25, 256  ;;  %p1090_p10 = pneg %p1324_p9 }
  0x1e   : > { %p1089_p2 = scmp.ne.s32.totalorder %s1087_s25, %s1088_s29  ;;  %p1094_p0 = scmp.lt.s32.totalorder %s1087_s25, %s1506_s0 }
  0x1f   : > { %p1095_p5 = scmp.lt.s32.totalorder %s1093_s8, %s1088_s29 }
  0x20   : > { %p1091_p12 = pnand %p1090_p10, %p1089_p2 }
  0x21   : > { %p1096_p7 = por %p1095_p5, %p1094_p0 }
  0x22   : > { %p1092_p13 = pneg %p1091_p12 }
  0x24   : > { %p1097_p11 = pnand %p1096_p7, %p1092_p13 }
  0x26   : > { %1100 = shalt.err (!%p1097_p11)
}
  0x27   : > { %1007 = dma.hbm_to_vmem [thread:$0]  (!%p1324_p9), %s166_s17, 4096, %s168_s21, %s156_s24, %s1221_s27, %s1221_s27, %s1222_s28  }
  0x28   : > { %179 = sbr.rel (%p1288_p8) target bundleno = 290 (0x122), region = 28  ;;  %s1344_s6 = sand.u32 (!%p1288_p8), 1, %s1210_s13  }
  0x29   : > { %s737_s11 = sshll.u32 (!%p1288_p8), %s1344_s6, 8  ;;  %s182_s20 = scalar_lea.sflag (!%p1288_p8), [#allocation3], %s1344_s6 }
  0x2a   : > { %s1348_s25 = scalar_lea.vmem (!%p1288_p8), [#allocation2], %s737_s11 }
  0x2d   : > { %1189 = dma.done.wait (%p1275_p4), %s182_s20, 4096  }
  0x2e   : > { %1191 = vsyncadd (%p1275_p4), %s182_s20, 4294963200 }
  0x2f   : > { %1193 = dma.done.wait (%p45_p1), [#allocation6], 2048  }
  0x30   : > { %1195 = vsyncadd (%p45_p1), [#allocation6], 4294965248  ;;  %v269_v0 = vld [vmem:[#allocation5 + $0x78] sm:$0xff]  ;;  %v268_v1 = vld [vmem:[#allocation5 + $0x70] sm:$0xff]  ;;  %s739_s18 = sshll.u32 %s1344_s6, 7  ;;  %s750_s28 = sshll.u32 %s1266_s16, 7 }
  0x31   : > { %270 = vmatpush.msra.mxu0 %v269_v0  ;;  %942 = vmatpush.msra.mxu1 %v269_v0  ;;  %v267_v2 = vld [vmem:[#allocation5 + $0x68] sm:$0xff]  ;;  %v266_v3 = vld [vmem:[#allocation5 + $0x60] sm:$0xff]  ;;  %v265_v4 = vld [vmem:[#allocation5 + $0x58] sm:$0xff]  ;;  %s1393_s23 = scalar_lea.vmem [#allocation7], %s739_s18  ;;  %s1399_s27 = scalar_lea.vmem [#allocation8], %s739_s18 }
  0x32   : > { %943 = vmatpush.msra.mxu2 %v269_v0  ;;  %944 = vmatpush.msra.mxu3 %v269_v0  ;;  %v264_v5 = vld [vmem:[#allocation5 + $0x50] sm:$0xff]  ;;  %v263_v6 = vld [vmem:[#allocation5 + $0x48] sm:$0xff]  ;;  %v262_v7 = vld [vmem:[#allocation5 + $0x40] sm:$0xff]  ;;  %s592_s22 = scalar_lea.hbm %s1508_s2, %s750_s28  ;;  %s593_s24 = sshll.u32 %s1393_s23, 4  ;;  %s1450_s24 = int_to_ptr.vmem [resolvable:$true] %s593_s24 }
  0x33   : > { %271 = vmatpush.msra.mxu0 %v268_v1  ;;  %945 = vmatpush.msra.mxu1 %v268_v1  ;;  %v261_v8 = vld [vmem:[#allocation5 + $0x38] sm:$0xff]  ;;  %v260_v9 = vld [vmem:[#allocation5 + $0x30] sm:$0xff]  ;;  %v259_v10 = vld [vmem:[#allocation5 + $0x28] sm:$0xff]  ;;  %s595_s29 = sshll.u32 %s592_s22, 4  ;;  %s1447_s8 = scalar_lea.hbm %s1509_s3, %s750_s28  ;;  %s1452_s29 = int_to_ptr.hbm [resolvable:$true] %s595_s29 }
  0x34   : > { %946 = vmatpush.msra.mxu2 %v268_v1  ;;  %947 = vmatpush.msra.mxu3 %v268_v1  ;;  %v258_v11 = vld [vmem:[#allocation5 + $0x20] sm:$0xff]  ;;  %v257_v12 = vld [vmem:[#allocation5 + $0x18] sm:$0xff]  ;;  %v256_v13 = vld [vmem:[#allocation5 + $0x10] sm:$0xff]  ;;  %s610_s16 = sshll.u32 %s1399_s27, 4  ;;  %s612_s9 = sshll.u32 %s1447_s8, 4  ;;  %s611_s16 = int_to_ptr.vmem [resolvable:$true] %s610_s16  ;;  %s613_s9 = int_to_ptr.hbm [resolvable:$true] %s612_s9 }
  0x35   : > { %272 = vmatpush.msra.mxu0 %v267_v2  ;;  %948 = vmatpush.msra.mxu1 %v267_v2  ;;  %v255_v14 = vld [vmem:[#allocation5 + $0x8] sm:$0xff]  ;;  %v254_v15 = vld [vmem:[#allocation5] sm:$0xff]  ;;  %v224_v24 = vld [vmem:[%s1348_s25 + $0x10] sm:$0xff]  ;;  %s576_s10 = scalar_lea.sflag [#allocation4], %s1344_s6  ;;  %s1130_s11 = sshra.s32 %s1452_s29, 4  ;;  %s1131_s11 = int_to_ptr.hbm [resolvable:$true] %s1130_s11 }
  0x36   : > { %949 = vmatpush.msra.mxu2 %v267_v2  ;;  %950 = vmatpush.msra.mxu3 %v267_v2  ;;  %v222_v16 = vld [vmem:[%s1348_s25] sm:$0xff]  ;;  %v223_v20 = vld [vmem:[%s1348_s25 + $0x8] sm:$0xff]  ;;  %v232_v25 = vld [vmem:[%s1348_s25 + $0x50] sm:$0xff]  ;;  %s1132_s20 = scalar_lea.hbm %s1131_s11, 128  ;;  %s1136_s28 = scalar_lea.hbm %s1508_s2, 256 }
  0x37   : > { %273 = vmatpush.msra.mxu0 %v266_v3  ;;  %951 = vmatpush.msra.mxu1 %v266_v3  ;;  %v230_v17 = vld [vmem:[%s1348_s25 + $0x40] sm:$0xff]  ;;  %v231_v21 = vld [vmem:[%s1348_s25 + $0x48] sm:$0xff]  ;;  %v240_v26 = vld [vmem:[%s1348_s25 + $0x90] sm:$0xff]  ;;  %p1133_p1 = scmp.ne.s32.totalorder %s1131_s11, %s1132_s20  ;;  %p1137_p11 = scmp.lt.s32.totalorder %s1131_s11, %s1508_s2 }
  0x38   : > { %952 = vmatpush.msra.mxu2 %v266_v3  ;;  %953 = vmatpush.msra.mxu3 %v266_v3  ;;  %v238_v18 = vld [vmem:[%s1348_s25 + $0x80] sm:$0xff]  ;;  %v239_v22 = vld [vmem:[%s1348_s25 + $0x88] sm:$0xff]  ;;  %v248_v27 = vld [vmem:[%s1348_s25 + $0xd0] sm:$0xff]  ;;  %p1138_p9 = scmp.lt.s32.totalorder %s1136_s28, %s1132_s20 }
  0x39   : > { %274 = vmatpush.msra.mxu0 %v265_v4  ;;  %954 = vmatpush.msra.mxu1 %v265_v4  ;;  %v246_v19 = vld [vmem:[%s1348_s25 + $0xc0] sm:$0xff]  ;;  %v247_v23 = vld [vmem:[%s1348_s25 + $0xc8] sm:$0xff]  ;;  %v225_v28 = vld [vmem:[%s1348_s25 + $0x18] sm:$0xff]  ;;  %p1134_p4 = pnand %p1133_p1, %p1314_p3 }
  0x3a   : > { %955 = vmatpush.msra.mxu2 %v265_v4  ;;  %956 = vmatpush.msra.mxu3 %v265_v4  ;;  %v233_v29 = vld [vmem:[%s1348_s25 + $0x58] sm:$0xff]  ;;  %v226_v32 = vld [vmem:[%s1348_s25 + $0x20] sm:$0xff]  ;;  %v227_v36 = vld [vmem:[%s1348_s25 + $0x28] sm:$0xff]  ;;  %p1139_p2 = por %p1138_p9, %p1137_p11 }
  0x3b   : > { %275 = vmatpush.msra.mxu0 %v264_v5  ;;  %957 = vmatpush.msra.mxu1 %v264_v5  ;;  %v241_v30 = vld [vmem:[%s1348_s25 + $0x98] sm:$0xff]  ;;  %v234_v33 = vld [vmem:[%s1348_s25 + $0x60] sm:$0xff]  ;;  %v235_v37 = vld [vmem:[%s1348_s25 + $0x68] sm:$0xff]  ;;  %p1135_p8 = pneg %p1134_p4 }
  0x3c   : > { %958 = vmatpush.msra.mxu2 %v264_v5  ;;  %959 = vmatpush.msra.mxu3 %v264_v5  ;;  %v249_v31 = vld [vmem:[%s1348_s25 + $0xd8] sm:$0xff]  ;;  %v242_v34 = vld [vmem:[%s1348_s25 + $0xa0] sm:$0xff]  ;;  %v243_v38 = vld [vmem:[%s1348_s25 + $0xa8] sm:$0xff] }
  0x3d   : > { %276 = vmatpush.msra.mxu0 %v263_v6  ;;  %960 = vmatpush.msra.mxu1 %v263_v6  ;;  %v250_v35 = vld [vmem:[%s1348_s25 + $0xe0] sm:$0xff]  ;;  %v251_v39 = vld [vmem:[%s1348_s25 + $0xe8] sm:$0xff]  ;;  %v228_v40 = vld [vmem:[%s1348_s25 + $0x30] sm:$0xff]  ;;  %p1140_p10 = pnand %p1139_p2, %p1135_p8 }
  0x3e   : > { %961 = vmatpush.msra.mxu2 %v263_v6  ;;  %962 = vmatpush.msra.mxu3 %v263_v6  ;;  %v236_v41 = vld [vmem:[%s1348_s25 + $0x70] sm:$0xff]  ;;  %v229_v44 = vld [vmem:[%s1348_s25 + $0x38] sm:$0xff] }
  0x3f   : > { %277 = vmatpush.msra.mxu0 %v262_v7  ;;  %963 = vmatpush.msra.mxu1 %v262_v7  ;;  %v244_v42 = vld [vmem:[%s1348_s25 + $0xb0] sm:$0xff]  ;;  %v237_v45 = vld [vmem:[%s1348_s25 + $0x78] sm:$0xff] }
  0x40   : > { %964 = vmatpush.msra.mxu2 %v262_v7  ;;  %965 = vmatpush.msra.mxu3 %v262_v7  ;;  %v252_v43 = vld [vmem:[%s1348_s25 + $0xf0] sm:$0xff]  ;;  %v245_v46 = vld [vmem:[%s1348_s25 + $0xb8] sm:$0xff] }
  0x41   : > { %278 = vmatpush.msra.mxu0 %v261_v8  ;;  %966 = vmatpush.msra.mxu1 %v261_v8  ;;  %v253_v47 = vld [vmem:[%s1348_s25 + $0xf8] sm:$0xff] }
  0x42   : > { %967 = vmatpush.msra.mxu2 %v261_v8  ;;  %968 = vmatpush.msra.mxu3 %v261_v8 }
  0x43   : > { %279 = vmatpush.msra.mxu0 %v260_v9  ;;  %969 = vmatpush.msra.mxu1 %v260_v9 }
  0x44   : > { %970 = vmatpush.msra.mxu2 %v260_v9  ;;  %971 = vmatpush.msra.mxu3 %v260_v9 }
  0x45   : > { %280 = vmatpush.msra.mxu0 %v259_v10  ;;  %972 = vmatpush.msra.mxu1 %v259_v10 }
  0x46   : > { %973 = vmatpush.msra.mxu2 %v259_v10  ;;  %974 = vmatpush.msra.mxu3 %v259_v10 }
  0x47   : > { %281 = vmatpush.msra.mxu0 %v258_v11  ;;  %975 = vmatpush.msra.mxu1 %v258_v11 }
  0x48   : > { %976 = vmatpush.msra.mxu2 %v258_v11  ;;  %977 = vmatpush.msra.mxu3 %v258_v11 }
  0x49   : > { %282 = vmatpush.msra.mxu0 %v257_v12  ;;  %978 = vmatpush.msra.mxu1 %v257_v12 }
  0x4a   : > { %979 = vmatpush.msra.mxu2 %v257_v12  ;;  %980 = vmatpush.msra.mxu3 %v257_v12 }
  0x4b   : > { %283 = vmatpush.msra.mxu0 %v256_v13  ;;  %981 = vmatpush.msra.mxu1 %v256_v13 }
  0x4c   : > { %982 = vmatpush.msra.mxu2 %v256_v13  ;;  %983 = vmatpush.msra.mxu3 %v256_v13 }
  0x4d   : > { %284 = vmatpush.msra.mxu0 %v255_v14  ;;  %984 = vmatpush.msra.mxu1 %v255_v14 }
  0x4e   : > { %985 = vmatpush.msra.mxu2 %v255_v14  ;;  %986 = vmatpush.msra.mxu3 %v255_v14 }
  0x4f   : > { %285 = vmatpush.msra.mxu0 %v254_v15  ;;  %987 = vmatpush.msra.mxu1 %v254_v15 }
  0x50   : > { %988 = vmatpush.msra.mxu2 %v254_v15  ;;  %989 = vmatpush.msra.mxu3 %v254_v15 }
  0x51   : > { %286 = vmatmul.f32.vlgmr.msra.gmra.mxu0 %v222_v16  ;;  %310 = vmatmul.f32.vlgmr.msra.gmra.mxu1 %v230_v17 }
  0x52   : > { %334 = vmatmul.f32.vlgmr.msra.gmra.mxu2 %v238_v18  ;;  %358 = vmatmul.f32.vlgmr.msra.gmra.mxu3 %v246_v19 }
  0x59   : > { %289 = vmatmul.f32.gmra.mxu0 %v223_v20  ;;  %313 = vmatmul.f32.gmra.mxu1 %v231_v21 }
  0x5a   : > { %337 = vmatmul.f32.gmra.mxu2 %v239_v22  ;;  %361 = vmatmul.f32.gmra.mxu3 %v247_v23 }
  0x61   : > { %292 = vmatmul.f32.gmra.mxu0 %v224_v24  ;;  %316 = vmatmul.f32.gmra.mxu1 %v232_v25 }
  0x62   : > { %340 = vmatmul.f32.gmra.mxu2 %v240_v26  ;;  %364 = vmatmul.f32.gmra.mxu3 %v248_v27 }
  0x69   : > { %295 = vmatmul.f32.gmra.mxu0 %v225_v28  ;;  %319 = vmatmul.f32.gmra.mxu1 %v233_v29 }
  0x6a   : > { %343 = vmatmul.f32.gmra.mxu2 %v241_v30  ;;  %367 = vmatmul.f32.gmra.mxu3 %v249_v31 }
  0x71   : > { %298 = vmatmul.f32.gmra.mxu0 %v226_v32  ;;  %322 = vmatmul.f32.gmra.mxu1 %v234_v33 }
  0x72   : > { %346 = vmatmul.f32.gmra.mxu2 %v242_v34  ;;  %370 = vmatmul.f32.gmra.mxu3 %v250_v35 }
  0x79   : > { %301 = vmatmul.f32.gmra.mxu0 %v227_v36  ;;  %325 = vmatmul.f32.gmra.mxu1 %v235_v37 }
  0x7a   : > { %349 = vmatmul.f32.gmra.mxu2 %v243_v38  ;;  %373 = vmatmul.f32.gmra.mxu3 %v251_v39 }
  0x81   : > { %304 = vmatmul.f32.gmra.mxu0 %v228_v40  ;;  %328 = vmatmul.f32.gmra.mxu1 %v236_v41 }
  0x82   : > { %352 = vmatmul.f32.gmra.mxu2 %v244_v42  ;;  %376 = vmatmul.f32.gmra.mxu3 %v252_v43 }
  0x89   : > { %307 = vmatmul.f32.gmra.mxu0 %v229_v44  ;;  %331 = vmatmul.f32.gmra.mxu1 %v237_v45 }
  0x8a   : > { %355 = vmatmul.f32.gmra.mxu2 %v245_v46  ;;  %379 = vmatmul.f32.gmra.mxu3 %v253_v47 }
  0xce   : > { %v287_v48 = vpop.f32.mrf.mxu0  ;;  %v311_v49 = vpop.f32.mrf.mxu1 }
  0xcf   : > { %v383_v50 = vpack.c.bf16 %v287_v48, %v287_v48  ;;  %v391_v51 = vpack.c.bf16 %v311_v49, %v311_v49 }
  0xd1   : > { %v447_v54 = vunpack.c.l.bf16 %v383_v50  ;;  %v455_v55 = vunpack.c.l.bf16 %v391_v51 }
  0xd3   : > { %v479_v2 = vsub.f32 %v287_v48, %v447_v54  ;;  %v487_v3 = vsub.f32 %v311_v49, %v455_v55 }
  0xd5   : > { %v335_v52 = vpop.f32.mrf.mxu2  ;;  %v359_v53 = vpop.f32.mrf.mxu3 }
  0xd6   : > { %v290_v56 = vpop.f32.mrf.mxu0  ;;  %v314_v57 = vpop.f32.mrf.mxu1  ;;  %v399_v62 = vpack.c.bf16 %v335_v52, %v335_v52  ;;  %v407_v63 = vpack.c.bf16 %v359_v53, %v359_v53 }
  0xd7   : > { %v384_v58 = vpack.c.bf16 %v290_v56, %v290_v56  ;;  %v755_v59 = vpack.c.bf16 %v290_v56, %v287_v48  ;;  %v392_v60 = vpack.c.bf16 %v314_v57, %v314_v57  ;;  %v775_v61 = vpack.c.bf16 %v314_v57, %v311_v49 }
  0xd8   : > { %v463_v6 = vunpack.c.l.bf16 %v399_v62  ;;  %v471_v7 = vunpack.c.l.bf16 %v407_v63 }
  0xd9   : > { %756 = vst [vmem:[%s1393_s23] sm:$0xff] %v755_v59   ;;  %v448_v0 = vunpack.c.l.bf16 %v384_v58  ;;  %v456_v1 = vunpack.c.l.bf16 %v392_v60 }
  0xda   : > { %915 = vst [vmem:[%s1393_s23 + $0x20] sm:$0xff] %v775_v61   ;;  %v495_v20 = vsub.f32 %v335_v52, %v463_v6  ;;  %v503_v21 = vsub.f32 %v359_v53, %v471_v7 }
  0xdb   : > { %v480_v4 = vsub.f32 %v290_v56, %v448_v0  ;;  %v488_v5 = vsub.f32 %v314_v57, %v456_v1 }
  0xdd   : > { %v835_v8 = vpack.c.bf16 %v480_v4, %v479_v2  ;;  %v855_v9 = vpack.c.bf16 %v488_v5, %v487_v3  ;;  %v338_v10 = vpop.f32.mrf.mxu2  ;;  %v362_v11 = vpop.f32.mrf.mxu3 }
  0xde   : > { %v400_v12 = vpack.c.bf16 %v338_v10, %v338_v10  ;;  %v795_v13 = vpack.c.bf16 %v338_v10, %v335_v52  ;;  %v408_v14 = vpack.c.bf16 %v362_v11, %v362_v11  ;;  %v815_v15 = vpack.c.bf16 %v362_v11, %v359_v53  ;;  %v293_v16 = vpop.f32.mrf.mxu0  ;;  %v317_v17 = vpop.f32.mrf.mxu1 }
  0xdf   : > { %836 = vst [vmem:[%s1399_s27] sm:$0xff] %v835_v8   ;;  %v385_v24 = vpack.c.bf16 %v293_v16, %v293_v16  ;;  %v393_v25 = vpack.c.bf16 %v317_v17, %v317_v17 }
  0xe0   : > { %930 = vst [vmem:[%s1399_s27 + $0x20] sm:$0xff] %v855_v9   ;;  %v464_v18 = vunpack.c.l.bf16 %v400_v12  ;;  %v472_v19 = vunpack.c.l.bf16 %v408_v14 }
  0xe1   : > { %919 = vst [vmem:[%s1393_s23 + $0x40] sm:$0xff] %v795_v13   ;;  %v449_v30 = vunpack.c.l.bf16 %v385_v24  ;;  %v457_v31 = vunpack.c.l.bf16 %v393_v25 }
  0xe2   : > { %v496_v22 = vsub.f32 %v338_v10, %v464_v18  ;;  %923 = vst [vmem:[%s1393_s23 + $0x60] sm:$0xff] %v815_v15   ;;  %v504_v23 = vsub.f32 %v362_v11, %v472_v19 }
  0xe3   : > { %v481_v42 = vsub.f32 %v293_v16, %v449_v30  ;;  %v489_v43 = vsub.f32 %v317_v17, %v457_v31 }
  0xe4   : > { %v875_v26 = vpack.c.bf16 %v496_v22, %v495_v20  ;;  %v895_v27 = vpack.c.bf16 %v504_v23, %v503_v21 }
  0xe5   : > { %v341_v28 = vpop.f32.mrf.mxu2  ;;  %v365_v29 = vpop.f32.mrf.mxu3 }
  0xe6   : > { %934 = vst [vmem:[%s1399_s27 + $0x40] sm:$0xff] %v875_v26   ;;  %v296_v32 = vpop.f32.mrf.mxu0  ;;  %v320_v33 = vpop.f32.mrf.mxu1  ;;  %v401_v38 = vpack.c.bf16 %v341_v28, %v341_v28  ;;  %v409_v39 = vpack.c.bf16 %v365_v29, %v365_v29 }
  0xe7   : > { %938 = vst [vmem:[%s1399_s27 + $0x60] sm:$0xff] %v895_v27   ;;  %v386_v34 = vpack.c.bf16 %v296_v32, %v296_v32  ;;  %v760_v35 = vpack.c.bf16 %v296_v32, %v293_v16  ;;  %v394_v36 = vpack.c.bf16 %v320_v33, %v320_v33  ;;  %v780_v37 = vpack.c.bf16 %v320_v33, %v317_v17 }
  0xe8   : > { %v465_v46 = vunpack.c.l.bf16 %v401_v38  ;;  %v473_v47 = vunpack.c.l.bf16 %v409_v39 }
  0xe9   : > { %912 = vst [vmem:[%s1393_s23 + $0x8] sm:$0xff] %v760_v35   ;;  %v450_v40 = vunpack.c.l.bf16 %v386_v34  ;;  %v458_v41 = vunpack.c.l.bf16 %v394_v36 }
  0xea   : > { %916 = vst [vmem:[%s1393_s23 + $0x28] sm:$0xff] %v780_v37   ;;  %v497_v60 = vsub.f32 %v341_v28, %v465_v46  ;;  %v505_v61 = vsub.f32 %v365_v29, %v473_v47 }
  0xeb   : > { %v482_v44 = vsub.f32 %v296_v32, %v450_v40  ;;  %v490_v45 = vsub.f32 %v320_v33, %v458_v41 }
  0xed   : > { %v840_v48 = vpack.c.bf16 %v482_v44, %v481_v42  ;;  %v860_v49 = vpack.c.bf16 %v490_v45, %v489_v43  ;;  %v344_v50 = vpop.f32.mrf.mxu2  ;;  %v368_v51 = vpop.f32.mrf.mxu3 }
  0xee   : > { %v402_v52 = vpack.c.bf16 %v344_v50, %v344_v50  ;;  %v800_v53 = vpack.c.bf16 %v344_v50, %v341_v28  ;;  %v410_v54 = vpack.c.bf16 %v368_v51, %v368_v51  ;;  %v820_v55 = vpack.c.bf16 %v368_v51, %v365_v29  ;;  %v299_v56 = vpop.f32.mrf.mxu0  ;;  %v323_v57 = vpop.f32.mrf.mxu1 }
  0xef   : > { %927 = vst [vmem:[%s1399_s27 + $0x8] sm:$0xff] %v840_v48   ;;  %v387_v0 = vpack.c.bf16 %v299_v56, %v299_v56  ;;  %v395_v1 = vpack.c.bf16 %v323_v57, %v323_v57 }
  0xf0   : > { %931 = vst [vmem:[%s1399_s27 + $0x28] sm:$0xff] %v860_v49   ;;  %v466_v58 = vunpack.c.l.bf16 %v402_v52  ;;  %v474_v59 = vunpack.c.l.bf16 %v410_v54 }
  0xf1   : > { %920 = vst [vmem:[%s1393_s23 + $0x48] sm:$0xff] %v800_v53   ;;  %v451_v6 = vunpack.c.l.bf16 %v387_v0  ;;  %v459_v7 = vunpack.c.l.bf16 %v395_v1 }
  0xf2   : > { %v498_v62 = vsub.f32 %v344_v50, %v466_v58  ;;  %924 = vst [vmem:[%s1393_s23 + $0x68] sm:$0xff] %v820_v55   ;;  %v506_v63 = vsub.f32 %v368_v51, %v474_v59 }
  0xf3   : > { %v483_v18 = vsub.f32 %v299_v56, %v451_v6  ;;  %v491_v19 = vsub.f32 %v323_v57, %v459_v7 }
  0xf4   : > { %v880_v2 = vpack.c.bf16 %v498_v62, %v497_v60  ;;  %v900_v3 = vpack.c.bf16 %v506_v63, %v505_v61 }
  0xf5   : > { %v347_v4 = vpop.f32.mrf.mxu2  ;;  %v371_v5 = vpop.f32.mrf.mxu3 }
  0xf6   : > { %935 = vst [vmem:[%s1399_s27 + $0x48] sm:$0xff] %v880_v2   ;;  %v302_v8 = vpop.f32.mrf.mxu0  ;;  %v326_v9 = vpop.f32.mrf.mxu1  ;;  %v403_v14 = vpack.c.bf16 %v347_v4, %v347_v4  ;;  %v411_v15 = vpack.c.bf16 %v371_v5, %v371_v5 }
  0xf7   : > { %939 = vst [vmem:[%s1399_s27 + $0x68] sm:$0xff] %v900_v3   ;;  %v388_v10 = vpack.c.bf16 %v302_v8, %v302_v8  ;;  %v765_v11 = vpack.c.bf16 %v302_v8, %v299_v56  ;;  %v396_v12 = vpack.c.bf16 %v326_v9, %v326_v9  ;;  %v785_v13 = vpack.c.bf16 %v326_v9, %v323_v57 }
  0xf8   : > { %v467_v22 = vunpack.c.l.bf16 %v403_v14  ;;  %v475_v23 = vunpack.c.l.bf16 %v411_v15 }
  0xf9   : > { %913 = vst [vmem:[%s1393_s23 + $0x10] sm:$0xff] %v765_v11   ;;  %v452_v16 = vunpack.c.l.bf16 %v388_v10  ;;  %v460_v17 = vunpack.c.l.bf16 %v396_v12 }
  0xfa   : > { %917 = vst [vmem:[%s1393_s23 + $0x30] sm:$0xff] %v785_v13   ;;  %v499_v36 = vsub.f32 %v347_v4, %v467_v22  ;;  %v507_v37 = vsub.f32 %v371_v5, %v475_v23 }
  0xfb   : > { %v484_v20 = vsub.f32 %v302_v8, %v452_v16  ;;  %v492_v21 = vsub.f32 %v326_v9, %v460_v17 }
  0xfd   : > { %v845_v24 = vpack.c.bf16 %v484_v20, %v483_v18  ;;  %v865_v25 = vpack.c.bf16 %v492_v21, %v491_v19  ;;  %v350_v26 = vpop.f32.mrf.mxu2  ;;  %v374_v27 = vpop.f32.mrf.mxu3 }
  0xfe   : > { %v404_v28 = vpack.c.bf16 %v350_v26, %v350_v26  ;;  %v805_v29 = vpack.c.bf16 %v350_v26, %v347_v4  ;;  %v412_v30 = vpack.c.bf16 %v374_v27, %v374_v27  ;;  %v825_v31 = vpack.c.bf16 %v374_v27, %v371_v5  ;;  %v305_v32 = vpop.f32.mrf.mxu0  ;;  %v329_v33 = vpop.f32.mrf.mxu1 }
  0xff   : > { %928 = vst [vmem:[%s1399_s27 + $0x10] sm:$0xff] %v845_v24   ;;  %v389_v40 = vpack.c.bf16 %v305_v32, %v305_v32  ;;  %v397_v41 = vpack.c.bf16 %v329_v33, %v329_v33 }
 0x100   : > { %932 = vst [vmem:[%s1399_s27 + $0x30] sm:$0xff] %v865_v25   ;;  %v468_v34 = vunpack.c.l.bf16 %v404_v28  ;;  %v476_v35 = vunpack.c.l.bf16 %v412_v30 }
 0x101   : > { %921 = vst [vmem:[%s1393_s23 + $0x50] sm:$0xff] %v805_v29   ;;  %v453_v46 = vunpack.c.l.bf16 %v389_v40  ;;  %v461_v47 = vunpack.c.l.bf16 %v397_v41 }
 0x102   : > { %v500_v38 = vsub.f32 %v350_v26, %v468_v34  ;;  %925 = vst [vmem:[%s1393_s23 + $0x70] sm:$0xff] %v825_v31   ;;  %v508_v39 = vsub.f32 %v374_v27, %v476_v35 }
 0x103   : > { %v485_v58 = vsub.f32 %v305_v32, %v453_v46  ;;  %v493_v59 = vsub.f32 %v329_v33, %v461_v47 }
 0x104   : > { %v885_v42 = vpack.c.bf16 %v500_v38, %v499_v36  ;;  %v905_v43 = vpack.c.bf16 %v508_v39, %v507_v37 }
 0x105   : > { %v1421_v44 = vpop.f32.mrf.mxu2  ;;  %v1423_v45 = vpop.f32.mrf.mxu3 }
 0x106   : > { %936 = vst [vmem:[%s1399_s27 + $0x50] sm:$0xff] %v885_v42   ;;  %v308_v48 = vpop.f32.mrf.mxu0  ;;  %v332_v49 = vpop.f32.mrf.mxu1  ;;  %v405_v54 = vpack.c.bf16 %v1421_v44, %v1421_v44  ;;  %v413_v55 = vpack.c.bf16 %v1423_v45, %v1423_v45 }
 0x107   : > { %940 = vst [vmem:[%s1399_s27 + $0x70] sm:$0xff] %v905_v43   ;;  %v390_v50 = vpack.c.bf16 %v308_v48, %v308_v48  ;;  %v770_v51 = vpack.c.bf16 %v308_v48, %v305_v32  ;;  %v398_v52 = vpack.c.bf16 %v332_v49, %v332_v49  ;;  %v790_v53 = vpack.c.bf16 %v332_v49, %v329_v33 }
 0x108   : > { %v469_v62 = vunpack.c.l.bf16 %v405_v54  ;;  %v477_v63 = vunpack.c.l.bf16 %v413_v55 }
 0x109   : > { %914 = vst [vmem:[%s1393_s23 + $0x18] sm:$0xff] %v770_v51   ;;  %v454_v56 = vunpack.c.l.bf16 %v390_v50  ;;  %v462_v57 = vunpack.c.l.bf16 %v398_v52 }
 0x10a   : > { %918 = vst [vmem:[%s1393_s23 + $0x38] sm:$0xff] %v790_v53   ;;  %v501_v10 = vsub.f32 %v1421_v44, %v469_v62  ;;  %v509_v11 = vsub.f32 %v1423_v45, %v477_v63 }
 0x10b   : > { %v486_v60 = vsub.f32 %v308_v48, %v454_v56  ;;  %v494_v61 = vsub.f32 %v332_v49, %v462_v57 }
 0x10d   : > { %v850_v0 = vpack.c.bf16 %v486_v60, %v485_v58  ;;  %v870_v1 = vpack.c.bf16 %v494_v61, %v493_v59  ;;  %v356_v2 = vpop.f32.mrf.mxu2  ;;  %v380_v3 = vpop.f32.mrf.mxu3 }
 0x10e   : > { %v406_v4 = vpack.c.bf16 %v356_v2, %v356_v2  ;;  %v810_v5 = vpack.c.bf16 %v356_v2, %v1421_v44  ;;  %v414_v6 = vpack.c.bf16 %v380_v3, %v380_v3  ;;  %v830_v7 = vpack.c.bf16 %v380_v3, %v1423_v45 }
 0x10f   : > { %929 = vst [vmem:[%s1399_s27 + $0x18] sm:$0xff] %v850_v0  }
 0x110   : > { %933 = vst [vmem:[%s1399_s27 + $0x38] sm:$0xff] %v870_v1   ;;  %v470_v8 = vunpack.c.l.bf16 %v406_v4  ;;  %v478_v9 = vunpack.c.l.bf16 %v414_v6 }
 0x111   : > { %922 = vst [vmem:[%s1393_s23 + $0x58] sm:$0xff] %v810_v5  }
 0x112   : > { %v502_v12 = vsub.f32 %v356_v2, %v470_v8  ;;  %926 = vst [vmem:[%s1393_s23 + $0x78] sm:$0xff] %v830_v7   ;;  %v510_v13 = vsub.f32 %v380_v3, %v478_v9 }
 0x113   : > { %1143 = shalt.err (!%p1140_p10)
}
 0x114   : > { %s1223_s23 = smov 64   ;;  %s1224_s22 = smov 4   ;;  %v890_v14 = vpack.c.bf16 %v502_v12, %v501_v10  ;;  %v910_v15 = vpack.c.bf16 %v510_v13, %v509_v11 }
 0x115   : > { %996 = dma.vmem_to_hbm [thread:$0]  (%p1314_p3), %s1450_s24, 2048, %s1452_s29, %s576_s10, %s1223_s23, %s1223_s23, %s1224_s22  }
 0x116   : > { %937 = vst [vmem:[%s1399_s27 + $0x58] sm:$0xff] %v890_v14   ;;  %s581_s30 = scalar_lea.sflag [#allocation9], %s1344_s6  ;;  %s1158_s7 = sshra.s32 %s613_s9, 4  ;;  %s1159_s7 = int_to_ptr.hbm [resolvable:$true] %s1158_s7 }
 0x117   : > { %941 = vst [vmem:[%s1399_s27 + $0x78] sm:$0xff] %v910_v15   ;;  %s1160_s8 = scalar_lea.hbm %s1159_s7, 128  ;;  %s1164_s25 = scalar_lea.hbm %s1509_s3, 256 }
 0x118   : > { %p1161_p12 = scmp.ne.s32.totalorder %s1159_s7, %s1160_s8  ;;  %p1165_p5 = scmp.lt.s32.totalorder %s1159_s7, %s1509_s3 }
 0x119   : > { %p1166_p7 = scmp.lt.s32.totalorder %s1164_s25, %s1160_s8 }
 0x11a   : > { %p1162_p13 = pnand %p1161_p12, %p1314_p3 }
 0x11b   : > { %p1167_p1 = por %p1166_p7, %p1165_p5 }
 0x11c   : > { %p1163_p0 = pneg %p1162_p13 }
 0x11e   : > { %p1168_p4 = pnand %p1167_p1, %p1163_p0 }
 0x120   : > { %1171 = shalt.err (!%p1168_p4)
}
 0x121   : > { %997 = dma.vmem_to_hbm [thread:$0]  (%p1314_p3), %s611_s16, 2048, %s613_s9, %s581_s30, %s1223_s23, %s1223_s23, %s1224_s22  }
 0x122 PF: > { %s627_s6 = sand.u32 1, %s1206_s12   ;;  %p1515_p8 = scmp.ge.s32.totalorder %s1218_s15, 2 }
 0x123   : > { %s628_s27 = scalar_lea.sflag [#allocation4], %s627_s6 }
 0x124   : > { %p1009_p11 = pnand %p1515_p8, %p1280_p6 }
 0x126   : > { %p1010_p9 = pneg %p1009_p11 }
 0x128   : > { %1197 = dma.done.wait (%p1010_p9), %s628_s27, 2048  }
 0x129   : > { %1199 = vsyncadd (%p1010_p9), %s628_s27, 4294965248  ;;  %s638_s29 = scalar_lea.sflag [#allocation9], %s627_s6 }
 0x12a   : > { %1201 = dma.done.wait (%p1010_p9), %s638_s29, 2048  }
 0x12b   : > { %1203 = vsyncadd (%p1010_p9), %s638_s29, 4294965248  ;;  %p21_p3 = scmp.ge.s32.totalorder %s1298_s26, 4   ;;  %s1516_s12 = smov %s1210_s13 }
 0x12c   : > { %s1517_s13 = smov %s1214_s14  ;;  %s1518_s14 = smov %s1310_s4 }
 0x12d   : > { %s1519_s15 = smov %s1298_s26  ;;  %23 = sbr.rel (!%p21_p3) target bundleno = 8 (0x8), region = 94 }
 0x132   :  { %644 = vsyncpa [#allocation3], 1 }
 0x133   :  { %646 = vsyncpa [#allocation3 + $0x1], 1 }
 0x134   :  { %647 = vsyncpa [#allocation6], 1 }
 0x135   :  { %648 = vsyncpa [#allocation4], 1 }
 0x136   :  { %650 = vsyncpa [#allocation4 + $0x1], 1 }
 0x137   :  { %651 = vsyncpa [#allocation9], 1 }
 0x138   :  { %653 = vsyncpa [#allocation9 + $0x1], 1 }

</bundles_post_ra>
